<compile_context>
chip_gen: v5e
topology: v5e:2x2
jax: 0.10.0
libtpu: 0.0.40
codegen_flags: <defaults>
</compile_context>

<pallas_src>
import functools

import jax
import jax.numpy as jnp
from jax.experimental import pallas as pl
from jax.experimental.pallas import tpu as pltpu

LANE = 128


def _swish_kernel(x_ref, o_ref, *, beta):
    x = x_ref[...]
    # beta is a static Python float (weak-typed) -> math stays in input dtype.
    z = x if beta == 1.0 else x * beta
    # sigmoid(z) = 0.5 * tanh(0.5 * z) + 0.5  -- tanh runs on the EUP, the
    # remaining ops are cheap VPU mul/adds (no f32 divide sequence).
    sig = 0.5 * jnp.tanh(0.5 * z) + 0.5
    o_ref[...] = x * sig


def _swish_jnp(x, beta):
    return x * jax.nn.sigmoid(x * beta)


def _sublane_multiple(dtype):
    # f32 -> 8, bf16 -> 16, int8/fp8 -> 32 (sub-32-bit dtypes pack sublanes).
    itemsize = jnp.dtype(dtype).itemsize
    return max(8, 32 // max(1, itemsize))


def _choose_tile_rows(rows, sub, tile_rows):
    if rows < 2 * sub:
        # Tiny input: single full-extent block (legal even when rows % sub != 0
        # because the block equals the full array dims).
        return rows
    # At least 2 grid steps (v7x has 2 TensorCores), roughly balanced, and a
    # multiple of the dtype's sublane packing factor.  Large inputs naturally
    # get many steps from the tile_rows cap.
    steps = max(2, pl.cdiv(rows, tile_rows))
    return pl.cdiv(pl.cdiv(rows, steps), sub) * sub


@functools.partial(jax.jit, static_argnames=("beta", "tile_rows"))
def swish(x, *, beta=1.0, tile_rows=8192):
    """Elementwise Swish on an arbitrary-shaped array (e.g. NCHW)."""
    orig_shape = x.shape
    dtype = x.dtype
    n = x.size
    flat = jnp.ravel(x)

    rows = n // LANE
    rem = n - rows * LANE

    if rows == 0:
        # Fewer than 128 elements: not worth a kernel launch.
        return _swish_jnp(flat, beta).reshape(orig_shape)

    main = flat if rem == 0 else flat[: rows * LANE]
    slab = main.reshape(rows, LANE)  # contiguous reshape: free bitcast

    sub = _sublane_multiple(dtype)
    tr = _choose_tile_rows(rows, sub, tile_rows)
    grid = pl.cdiv(rows, tr)

    # VMEM budget: one input + one output block, each double-buffered, + headroom.
    block_bytes = tr * LANE * jnp.dtype(dtype).itemsize
    vmem_limit = int(max(16 * 1024 * 1024, 4 * block_bytes + 4 * 1024 * 1024))

    out = pl.pallas_call(
        functools.partial(_swish_kernel, beta=beta),
        out_shape=jax.ShapeDtypeStruct((rows, LANE), dtype),
        grid_spec=pltpu.PrefetchScalarGridSpec(
            num_scalar_prefetch=0,
            grid=(grid,),
            in_specs=[pl.BlockSpec((tr, LANE), lambda i: (i, 0))],
            out_specs=pl.BlockSpec((tr, LANE), lambda i: (i, 0)),
        ),
        compiler_params=pltpu.CompilerParams(
            dimension_semantics=("parallel",),
            vmem_limit_bytes=vmem_limit,
        ),
    )(slab)

    if rem == 0:
        return out.reshape(orig_shape)

    # Rare ragged case: < 128 leftover elements handled outside the kernel.
    tail = _swish_jnp(flat[rows * LANE:], beta)
    return jnp.concatenate([out.reshape(-1), tail]).reshape(orig_shape)


if __name__ == "__main__":
    key = jax.random.PRNGKey(0)
    k0, k1 = jax.random.split(key)

    # NCHW, matching PyTorch conv-style activations.
    x = jax.random.normal(k0, (2, 4, 16, 16), dtype=jnp.float32) * 4.0
    y = jax.block_until_ready(swish(x, beta=1.0))
    y_ref = _swish_jnp(x, 1.0)
    assert y.shape == x.shape and y.dtype == x.dtype
    assert jnp.allclose(y, y_ref, atol=1e-5, rtol=1e-5)

    # Ragged size (n % 128 != 0) and beta != 1.0 exercise the tail path.
    x2 = jax.random.normal(k1, (5, 100), dtype=jnp.float32) * 3.0
    y2 = jax.block_until_ready(swish(x2, beta=1.5))
    y2_ref = _swish_jnp(x2, 1.5)
    assert y2.shape == x2.shape and y2.dtype == x2.dtype
    assert jnp.allclose(y2, y2_ref, atol=1e-5, rtol=1e-5)

    print("KERNEL_OK")
</pallas_src>

<mosaic_0001>
module attributes {stable_mosaic.version = 11 : i64} {
  func.func @_swish_kernel(%arg0: i32, %arg1: memref<8x128xf32, #tpu.memory_space<vmem>>, %arg2: memref<8x128xf32, #tpu.memory_space<vmem>>) attributes {dimension_semantics = [#tpu.dimension_semantics<parallel>], iteration_bounds = array<i64: 2>, scalar_prefetch = 0 : i64, scratch_operands = 0 : i64, tpu.core_type = #tpu.core_type<tc>, window_params = [{transform_indices = @transform_0, window_bounds = array<i64: 8, 128>}, {transform_indices = @transform_1, window_bounds = array<i64: 8, 128>}]} {
    %c0 = arith.constant 0 : index
    %c0_0 = arith.constant 0 : index
    %0 = vector.load %arg1[%c0, %c0_0] : memref<8x128xf32, #tpu.memory_space<vmem>>, vector<8x128xf32>
    %cst = arith.constant 5.000000e-01 : f32
    %1 = vector.broadcast %cst : f32 to vector<8x128xf32>
    %2 = arith.mulf %1, %0 : vector<8x128xf32>
    %3 = math.tanh %2 : vector<8x128xf32>
    %cst_1 = arith.constant 5.000000e-01 : f32
    %4 = vector.broadcast %cst_1 : f32 to vector<8x128xf32>
    %5 = arith.mulf %4, %3 : vector<8x128xf32>
    %cst_2 = arith.constant 5.000000e-01 : f32
    %6 = vector.broadcast %cst_2 : f32 to vector<8x128xf32>
    %7 = arith.addf %5, %6 : vector<8x128xf32>
    %8 = arith.mulf %0, %7 : vector<8x128xf32>
    %c0_3 = arith.constant 0 : index
    %c0_4 = arith.constant 0 : index
    %9 = vector.load %arg2[%c0_3, %c0_4] : memref<8x128xf32, #tpu.memory_space<vmem>>, vector<8x128xf32>
    tpu.vector_store %arg2[%c0_3, %c0_4], %8 {strides = array<i32>} : memref<8x128xf32, #tpu.memory_space<vmem>>, vector<8x128xf32>,
    return
  }
  func.func @transform_0(%arg0: i32) -> (i32, i32) {
    %c0_i32 = arith.constant 0 : i32
    %c0_i32_0 = arith.constant 0 : i32
    return %arg0, %c0_i32 : i32, i32
  }
  func.func @transform_1(%arg0: i32) -> (i32, i32) {
    %c0_i32 = arith.constant 0 : i32
    %c0_i32_0 = arith.constant 0 : i32
    return %arg0, %c0_i32 : i32, i32
  }
}

</mosaic_0001>

<bundles_post_ra>
// kernel: swish.1
= control target key start
LH: loop header
LB: loop body
LE: loop exit
PB: predicated region body
PF: predicated region fallthrough
CT: control target
= control target key end

     0   :  { %s195_s6 = smov 0   ;;  %s215_s0 = inlined_call_operand.vmem [shape: f32[16,128], index: 0, kind: input, shape index: {}]   ;;  %s216_s1 = inlined_call_operand.vmem [shape: f32[16,128], index: 1, kind: output, shape index: {}]  }
   0x1 LB: > { %s172_s7 = sadd.s32 4294967295, %s197_s6   ;;  %p176_p0 = scmp.ge.s32.totalorder %s197_s6, 1  ;;  %s197_s6 = sphi %s195_s6, %s11_s6  }
   0x2   : > { %p86_p1 = scmp.lt.s32.totalorder %s197_s6, 3 }
   0x4   : > { %p87_p2 = pnand %p176_p0, %p86_p1 }
   0x5   : > { %p104_p3 = scmp.lt.s32.totalorder (!%p87_p2), %s172_s7, 1 }
   0x6   : > { %90 = sbr.rel (%p87_p2) target bundleno = 31 (0x1f), region = 24 }
   0xb   : > { %s218_s7 = smov (!%p104_p3, %s172_s7), 1 }
   0xc   : > { %s177_s8 = sshll.u32 %s218_s7, 3 }
   0xd   : > { %s107_s11 = scalar_lea.vmem %s215_s0, %s177_s8  ;;  %s111_s14 = scalar_lea.vmem %s216_s1, %s177_s8 }
   0xe   : > { %v112_v0 = vld [vmem:[%s107_s11] sm:$0xff] }
   0xf   : > { %v113_v1 = vmul.f32 0.5, %v112_v0 }
  0x11   : > { %189 = vtanh.f32 %v113_v1 }
  0x17   : > { %v190_v2 = vpop.eup %189 }
  0x18   : > { %v115_v3 = vmul.f32 0.5, %v190_v2 }
  0x1a   : > { %v116_v4 = vadd.f32 0.5, %v115_v3 }
  0x1c   : > { %v117_v5 = vmul.f32 %v116_v4, %v112_v0 }
  0x1e   : > { %118 = vst [vmem:[%s111_s14] sm:$0xff] %v117_v5 }
  0x1f PF: > { %s11_s6 = sadd.s32 1, %s197_s6  }
  0x20   : > { %p8_p4 = scmp.ge.s32.totalorder %s11_s6, 4  }
  0x22   :  { %10 = sbr.rel (!%p8_p4) target bundleno = 1 (0x1), region = 54 }

</bundles_post_ra>
